<compile_context>
chip_gen: v7x
topology: tpu7x:2x2x1
jax: 0.10.0
libtpu: 0.0.40
codegen_flags: <defaults>
</compile_context>

<pallas_src>
import functools

import jax
import jax.numpy as jnp
from jax.experimental import pallas as pl
from jax.experimental.pallas import tpu as pltpu

D_FE = 32    # feature-extractor width
D_DISC = 16  # discriminator hidden width
D_PRED = 2   # prediction head width


def _round_up(x, m):
    return ((x + m - 1) // m) * m


def _pick_tile(n_rows, dim, budget_bytes=32 * 1024 * 1024):
    """Largest batch tile fitting a ~32 MiB VMEM working-set model.

    Every live (tile_n, <=128)-wide f32 array costs tile_n/8 vregs =
    tile_n * 512 B because the minor dim pads to 128 lanes, so the model
    charges: 2 domains x 2 double-buffered x tiles (lane-padded dim) plus ~6
    lane-padded intermediates per domain.  Keeping this under ~32 MiB leaves
    headroom inside v7x's 64 MiB physical VMEM (v5e/v6e have 128 MiB).
    """
    dim_pad = _round_up(dim, 128)
    per_row = 4 * (dim_pad * 4) + 12 * 512
    rows = max(128, (budget_bytes // per_row) // 128 * 128)   # multiple of 128
    n_pad8 = _round_up(max(n_rows, 8), 8)
    return n_pad8 if n_pad8 <= rows else rows


def darec_kernel(xs_ref, xt_ref, w1_ref, b1_ref, wd1_ref, bd1_ref,
                 wd2t_ref, bd2_ref, wpt_ref, bpt_ref,
                 pred_s_ref, pred_t_ref, loss_ref,
                 *, n_src, n_trg, tile_n):
    """One batch-tile grid step, processing the src AND trg tiles.

    xs/xt      : (tile_n, dim)   activation tiles (smaller domain clamps to its
                                 last block; out-of-range rows are masked)
    w1/b1      : (dim, 32)/(1,32)   fe Linear             (VMEM-resident)
    wd1/bd1    : (32, 16)/(1,16)    discriminator Linear1 (VMEM-resident)
    wd2t/bd2   : (1, 16)/(1,1)      discriminator Linear2 (transposed)
    wpt/bpt    : (8, 32)/(8,1)      pred Linear, transposed + zero-padded to 8
    pred_s/t   : (2, tile_n)        lane-dense transposed pred outputs
    loss_ref   : (1, 8, 128)        per-tile BCE partial sums (lane0=src, lane1=trg)
    """
    i = pl.program_id(0)
    row = i * tile_n + jax.lax.broadcasted_iota(jnp.int32, (tile_n, 1), 0)

    def run_domain(x, label_is_one, n_valid, pred_out_ref):
        # --- feature extractor: Linear -> ReLU -> Dropout (identity) ---
        h = jnp.dot(x, w1_ref[...], preferred_element_type=jnp.float32) + b1_ref[...]
        h = jnp.maximum(h, 0.0)
        # TODO(synk): nn.Dropout() training-mode randomness not implemented
        # (forward uses eval-mode identity semantics).

        # --- discriminator layer 1 (MXU) ---
        d1 = jnp.dot(h, wd1_ref[...], preferred_element_type=jnp.float32) + bd1_ref[...]
        d1 = jnp.maximum(d1, 0.0)

        # --- discriminator layer 2: N=1 matmul done on VPU + lane reduce ---
        z = jnp.sum(d1 * wd2t_ref[...], axis=-1, keepdims=True) + bd2_ref[...]  # (tile_n, 1)

        # --- pred head, computed directly transposed (lane-dense output):
        #     (8, 32) x (tile_n, 32) contracting the 32-dim -> (8, tile_n) ---
        p = jax.lax.dot_general(wpt_ref[...], h, (((1,), (1,)), ((), ())),
                                preferred_element_type=jnp.float32) + bpt_ref[...]
        pred_out_ref[...] = p[:D_PRED, :].astype(pred_out_ref.dtype)

        # --- BCE with logits vs constant label y:
        #     max(z,0) - z*y + log1p(exp(-|z|)); mask padded / out-of-range rows ---
        bce = jnp.maximum(z, 0.0) + jnp.log1p(jnp.exp(-jnp.abs(z)))
        if label_is_one:
            bce = bce - z
        bce = jnp.where(row < n_valid, bce, 0.0)
        return jnp.sum(bce)

    s_sum = run_domain(xs_ref[...], False, n_src, pred_s_ref)
    t_sum = run_domain(xt_ref[...], True, n_trg, pred_t_ref)

    # Per-tile partial loss sums in a lane-dense (8,128) block (lane0 = src,
    # lane1 = trg), reduced with jnp.sum outside.  Using a per-tile output
    # instead of a resident accumulator keeps the grid axis "parallel".
    sub = jax.lax.broadcasted_iota(jnp.int32, (8, 128), 0)
    lane = jax.lax.broadcasted_iota(jnp.int32, (8, 128), 1)
    vals = jnp.where(lane == 0, s_sum, jnp.where(lane == 1, t_sum, 0.0))
    loss_ref[0] = jnp.where(sub == 0, vals, 0.0)


def darec_forward(src, trg, params, *, tile_n=None):
    """Returns (src_out, trg_out, disc_loss), matching darec.forward."""
    n_src, dim = src.shape
    n_trg, dim_t = trg.shape
    assert dim == dim_t, "src/trg feature dims must match"

    n_max = max(n_src, n_trg)
    if tile_n is None:
        tile_n = _pick_tile(n_max, dim)
    n_tiles = pl.cdiv(n_max, tile_n)
    n_out = n_tiles * tile_n
    src_tiles = pl.cdiv(n_src, tile_n)
    trg_tiles = pl.cdiv(n_trg, tile_n)

    w1, b1 = params["w1"], params["b1"]
    wd1, bd1 = params["wd1"], params["bd1"]
    wd2_t = params["wd2"].T                                   # (1, 16)
    bd2 = params["bd2"]                                       # (1, 1)
    # pred weights transposed + zero-padded to 8 rows (MXU-friendly M); only
    # the first D_PRED rows of the result are stored.
    wp_t = jnp.zeros((8, D_FE), jnp.float32).at[:D_PRED].set(params["wp"].T)
    bp_t = jnp.zeros((8, 1), jnp.float32).at[:D_PRED].set(params["bp"].T)

    kernel = functools.partial(darec_kernel, n_src=n_src, n_trg=n_trg, tile_n=tile_n)

    grid_spec = pltpu.PrefetchScalarGridSpec(
        num_scalar_prefetch=0,
        grid=(n_tiles,),
        in_specs=[
            # src / trg tiles; the smaller domain clamps to its last block so
            # trailing grid steps re-use the resident buffer (DMA elided),
            # and the row mask in-kernel zeroes its loss contribution.
            pl.BlockSpec((tile_n, dim), lambda i: (jnp.minimum(i, src_tiles - 1), 0)),
            pl.BlockSpec((tile_n, dim), lambda i: (jnp.minimum(i, trg_tiles - 1), 0)),
            # weights: constant index maps -> VMEM-resident across the grid
            pl.BlockSpec((dim, D_FE), lambda i: (0, 0)),       # w1
            pl.BlockSpec((1, D_FE), lambda i: (0, 0)),          # b1
            pl.BlockSpec((D_FE, D_DISC), lambda i: (0, 0)),     # wd1
            pl.BlockSpec((1, D_DISC), lambda i: (0, 0)),        # bd1
            pl.BlockSpec((1, D_DISC), lambda i: (0, 0)),        # wd2^T
            pl.BlockSpec((1, 1), lambda i: (0, 0)),              # bd2
            pl.BlockSpec((8, D_FE), lambda i: (0, 0)),           # wp^T (padded)
            pl.BlockSpec((8, 1), lambda i: (0, 0)),               # bp^T (padded)
        ],
        out_specs=(
            pl.BlockSpec((D_PRED, tile_n), lambda i: (0, i)),     # pred src (transposed)
            pl.BlockSpec((D_PRED, tile_n), lambda i: (0, i)),     # pred trg (transposed)
            pl.BlockSpec((1, 8, 128), lambda i: (i, 0, 0)),       # per-tile loss sums
        ),
    )

    n_rows = n_src + n_trg
    cost = pl.CostEstimate(
        flops=2 * n_rows * (dim * D_FE + D_FE * D_DISC + D_DISC + D_FE * 8),
        transcendentals=2 * n_rows,  # exp + log1p per row
        bytes_accessed=4 * (n_rows * dim + 2 * n_out * D_PRED + n_tiles * 8 * 128
                            + dim * D_FE + D_FE * D_DISC + 10 * D_FE),
    )

    pred_s, pred_t, loss_tiles = pl.pallas_call(
        kernel,
        out_shape=(
            jax.ShapeDtypeStruct((D_PRED, n_out), jnp.float32),
            jax.ShapeDtypeStruct((D_PRED, n_out), jnp.float32),
            jax.ShapeDtypeStruct((n_tiles, 8, 128), jnp.float32),
        ),
        grid_spec=grid_spec,
        compiler_params=pltpu.CompilerParams(
            dimension_semantics=("parallel",),
            vmem_limit_bytes=48 * 1024 * 1024,
        ),
        cost_estimate=cost,
    )(src, trg, w1, b1, wd1, bd1, wd2_t, bd2, wp_t, bp_t)

    src_out = pred_s[:, :n_src].T
    trg_out = pred_t[:, :n_trg].T
    sums = jnp.sum(loss_tiles, axis=(0, 1))                   # (128,)
    disc_loss = sums[0] / n_src + sums[1] / n_trg
    return src_out, trg_out, disc_loss


def init_params(key, dim):
    """Deterministic parameter init (uniform, roughly matching torch default scale)."""
    ks = jax.random.split(key, 8)

    def lin(kw, kb, fan_in, fan_out):
        bound = 1.0 / jnp.sqrt(jnp.float32(fan_in))
        w = jax.random.uniform(kw, (fan_in, fan_out), jnp.float32, -bound, bound)
        b = jax.random.uniform(kb, (1, fan_out), jnp.float32, -bound, bound)
        return w, b

    w1, b1 = lin(ks[0], ks[1], dim, D_FE)        # fe Linear(dim, 32)
    wd1, bd1 = lin(ks[2], ks[3], D_FE, D_DISC)   # discriminator Linear(32, 16)
    wd2, bd2 = lin(ks[4], ks[5], D_DISC, 1)      # discriminator Linear(16, 1)
    wp, bp = lin(ks[6], ks[7], D_FE, D_PRED)     # pred Linear(32, 2)
    return dict(w1=w1, b1=b1, wd1=wd1, bd1=bd1, wd2=wd2, bd2=bd2, wp=wp, bp=bp)


def _reference_forward(src, trg, params):
    """Pure-JAX reference for numerical sanity check."""
    hp = jax.lax.Precision.HIGHEST

    def fe(x):
        return jnp.maximum(jnp.dot(x, params["w1"], precision=hp) + params["b1"], 0.0)

    def disc(h):
        d = jnp.maximum(jnp.dot(h, params["wd1"], precision=hp) + params["bd1"], 0.0)
        return (jnp.dot(d, params["wd2"], precision=hp) + params["bd2"])[:, 0]

    def bce(z, y):
        return jnp.mean(jnp.maximum(z, 0.0) - z * y + jnp.log1p(jnp.exp(-jnp.abs(z))))

    def pred(h):
        return jnp.dot(h, params["wp"], precision=hp) + params["bp"]

    hs, ht = fe(src), fe(trg)
    loss = bce(disc(hs), 0.0) + bce(disc(ht), 1.0)
    return pred(hs), pred(ht), loss


if __name__ == "__main__":
    key = jax.random.PRNGKey(0)
    k_src, k_trg, k_par, k_src2, k_trg2 = jax.random.split(key, 5)

    dim = 32
    params = init_params(k_par, dim)

    # --- small config (single tile) ---
    batch = 8
    src = jax.random.normal(k_src, (batch, dim), jnp.float32)
    trg = jax.random.normal(k_trg, (batch, dim), jnp.float32)

    fwd = jax.jit(darec_forward)
    src_out, trg_out, disc_loss = fwd(src, trg, params)
    jax.block_until_ready((src_out, trg_out, disc_loss))

    assert src_out.shape == (batch, 2)
    assert trg_out.shape == (batch, 2)
    assert disc_loss.shape == ()

    ref_src, ref_trg, ref_loss = _reference_forward(src, trg, params)
    assert jnp.allclose(src_out, ref_src, atol=5e-3, rtol=5e-3)
    assert jnp.allclose(trg_out, ref_trg, atol=5e-3, rtol=5e-3)
    assert jnp.allclose(disc_loss, ref_loss, atol=5e-3, rtol=5e-3)

    # --- multi-tile config: unequal domain sizes + partial last blocks ---
    n_s2, n_t2 = 300, 140
    src2 = jax.random.normal(k_src2, (n_s2, dim), jnp.float32)
    trg2 = jax.random.normal(k_trg2, (n_t2, dim), jnp.float32)

    fwd_tiled = jax.jit(functools.partial(darec_forward, tile_n=128))
    s2_out, t2_out, loss2 = fwd_tiled(src2, trg2, params)
    jax.block_until_ready((s2_out, t2_out, loss2))

    assert s2_out.shape == (n_s2, 2)
    assert t2_out.shape == (n_t2, 2)

    r_s2, r_t2, r_l2 = _reference_forward(src2, trg2, params)
    assert jnp.allclose(s2_out, r_s2, atol=5e-3, rtol=5e-3)
    assert jnp.allclose(t2_out, r_t2, atol=5e-3, rtol=5e-3)
    assert jnp.allclose(loss2, r_l2, atol=5e-3, rtol=5e-3)

    print("KERNEL_OK")
</pallas_src>

<mosaic_0001>
module attributes {stable_mosaic.version = 11 : i64} {
  func.func @darec_kernel(%arg0: i32, %arg1: memref<8x32xf32, #tpu.memory_space<vmem>>, %arg2: memref<8x32xf32, #tpu.memory_space<vmem>>, %arg3: memref<32x32xf32, #tpu.memory_space<vmem>>, %arg4: memref<1x32xf32, #tpu.memory_space<vmem>>, %arg5: memref<32x16xf32, #tpu.memory_space<vmem>>, %arg6: memref<1x16xf32, #tpu.memory_space<vmem>>, %arg7: memref<1x16xf32, #tpu.memory_space<vmem>>, %arg8: memref<1x1xf32, #tpu.memory_space<vmem>>, %arg9: memref<8x32xf32, #tpu.memory_space<vmem>>, %arg10: memref<8x1xf32, #tpu.memory_space<vmem>>, %arg11: memref<2x8xf32, #tpu.memory_space<vmem>>, %arg12: memref<2x8xf32, #tpu.memory_space<vmem>>, %arg13: memref<1x8x128xf32, #tpu.memory_space<vmem>>) attributes {dimension_semantics = [#tpu.dimension_semantics<parallel>], iteration_bounds = array<i64: 1>, scalar_prefetch = 0 : i64, scratch_operands = 0 : i64, tpu.core_type = #tpu.core_type<tc>, window_params = [{transform_indices = @transform_0, window_bounds = array<i64: 8, 32>}, {transform_indices = @transform_1, window_bounds = array<i64: 8, 32>}, {pipeline_mode = #tpu.pipeline_mode<synchronous>, transform_indices = @transform_2, window_bounds = array<i64: 32, 32>}, {pipeline_mode = #tpu.pipeline_mode<synchronous>, transform_indices = @transform_3, window_bounds = array<i64: 1, 32>}, {pipeline_mode = #tpu.pipeline_mode<synchronous>, transform_indices = @transform_4, window_bounds = array<i64: 32, 16>}, {pipeline_mode = #tpu.pipeline_mode<synchronous>, transform_indices = @transform_5, window_bounds = array<i64: 1, 16>}, {pipeline_mode = #tpu.pipeline_mode<synchronous>, transform_indices = @transform_6, window_bounds = array<i64: 1, 16>}, {pipeline_mode = #tpu.pipeline_mode<synchronous>, transform_indices = @transform_7, window_bounds = array<i64: 1, 1>}, {pipeline_mode = #tpu.pipeline_mode<synchronous>, transform_indices = @transform_8, window_bounds = array<i64: 8, 32>}, {pipeline_mode = #tpu.pipeline_mode<synchronous>, transform_indices = @transform_9, window_bounds = array<i64: 8, 1>}, {transform_indices = @transform_10, window_bounds = array<i64: 2, 8>}, {transform_indices = @transform_11, window_bounds = array<i64: 2, 8>}, {transform_indices = @transform_12, window_bounds = array<i64: 1, 8, 128>}]} {
    %c8_i32 = arith.constant 8 : i32
    %0 = arith.muli %arg0, %c8_i32 : i32
    %1 = tpu.iota {dimensions = array<i32: 0>} : vector<8x1xi32>
    %2 = vector.broadcast %0 : i32 to vector<8x1xi32>
    %3 = arith.addi %2, %1 : vector<8x1xi32>
    %c0 = arith.constant 0 : index
    %c0_0 = arith.constant 0 : index
    %4 = vector.load %arg1[%c0, %c0_0] : memref<8x32xf32, #tpu.memory_space<vmem>>, vector<8x32xf32>
    %c0_1 = arith.constant 0 : index
    %c0_2 = arith.constant 0 : index
    %5 = vector.load %arg3[%c0_1, %c0_2] : memref<32x32xf32, #tpu.memory_space<vmem>>, vector<32x32xf32>
    %cst = arith.constant dense<0.000000e+00> : vector<8x32xf32>
    %6 = tpu.matmul %4, %5, %cst {dimension_numbers = #tpu.dot_dimension_numbers<[1], [0], [0], [1], [0, 0, 1, 1], [], []>} : vector<8x32xf32>, vector<32x32xf32>, vector<8x32xf32> -> vector<8x32xf32>
    %c0_3 = arith.constant 0 : index
    %c0_4 = arith.constant 0 : index
    %7 = vector.load %arg4[%c0_3, %c0_4] : memref<1x32xf32, #tpu.memory_space<vmem>>, vector<1x32xf32>
    %8 = vector.broadcast %7 : vector<1x32xf32> to vector<8x32xf32>
    %9 = arith.addf %6, %8 : vector<8x32xf32>
    %cst_5 = arith.constant 0.000000e+00 : f32
    %10 = vector.broadcast %cst_5 : f32 to vector<8x32xf32>
    %11 = arith.maximumf %9, %10 : vector<8x32xf32>
    %c0_6 = arith.constant 0 : index
    %c0_7 = arith.constant 0 : index
    %12 = vector.load %arg5[%c0_6, %c0_7] : memref<32x16xf32, #tpu.memory_space<vmem>>, vector<32x16xf32>
    %cst_8 = arith.constant dense<0.000000e+00> : vector<8x16xf32>
    %13 = tpu.matmul %11, %12, %cst_8 {dimension_numbers = #tpu.dot_dimension_numbers<[1], [0], [0], [1], [0, 0, 1, 1], [], []>} : vector<8x32xf32>, vector<32x16xf32>, vector<8x16xf32> -> vector<8x16xf32>
    %c0_9 = arith.constant 0 : index
    %c0_10 = arith.constant 0 : index
    %14 = vector.load %arg6[%c0_9, %c0_10] : memref<1x16xf32, #tpu.memory_space<vmem>>, vector<1x16xf32>
    %15 = vector.broadcast %14 : vector<1x16xf32> to vector<8x16xf32>
    %16 = arith.addf %13, %15 : vector<8x16xf32>
    %cst_11 = arith.constant 0.000000e+00 : f32
    %17 = vector.broadcast %cst_11 : f32 to vector<8x16xf32>
    %18 = arith.maximumf %16, %17 : vector<8x16xf32>
    %c0_12 = arith.constant 0 : index
    %c0_13 = arith.constant 0 : index
    %19 = vector.load %arg7[%c0_12, %c0_13] : memref<1x16xf32, #tpu.memory_space<vmem>>, vector<1x16xf32>
    %20 = vector.broadcast %19 : vector<1x16xf32> to vector<8x16xf32>
    %21 = arith.mulf %18, %20 : vector<8x16xf32>
    %cst_14 = arith.constant dense<0.000000e+00> : vector<8xf32>
    %22 = vector.multi_reduction <add>, %21, %cst_14 [1] : vector<8x16xf32> to vector<8xf32>
    %23 = vector.shape_cast %22 : vector<8xf32> to vector<8x1xf32>
    %c0_15 = arith.constant 0 : index
    %c0_16 = arith.constant 0 : index
    %24 = vector.load %arg8[%c0_15, %c0_16] : memref<1x1xf32, #tpu.memory_space<vmem>>, vector<1x1xf32>
    %25 = vector.broadcast %24 : vector<1x1xf32> to vector<8x1xf32>
    %26 = arith.addf %23, %25 : vector<8x1xf32>
    %c0_17 = arith.constant 0 : index
    %c0_18 = arith.constant 0 : index
    %27 = vector.load %arg9[%c0_17, %c0_18] : memref<8x32xf32, #tpu.memory_space<vmem>>, vector<8x32xf32>
    %cst_19 = arith.constant dense<0.000000e+00> : vector<8x8xf32>
    %28 = tpu.matmul %27, %11, %cst_19 {dimension_numbers = #tpu.dot_dimension_numbers<[1], [1], [0], [0], [0, 0, 1, 0], [], []>} : vector<8x32xf32>, vector<8x32xf32>, vector<8x8xf32> -> vector<8x8xf32>
    %c0_20 = arith.constant 0 : index
    %c0_21 = arith.constant 0 : index
    %29 = vector.load %arg10[%c0_20, %c0_21] : memref<8x1xf32, #tpu.memory_space<vmem>>, vector<8x1xf32>
    %30 = vector.broadcast %29 : vector<8x1xf32> to vector<8x8xf32>
    %31 = arith.addf %28, %30 : vector<8x8xf32>
    %32 = vector.extract_strided_slice %31 {offsets = [0, 0], sizes = [2, 8], strides = [1, 1]} : vector<8x8xf32> to vector<2x8xf32>
    %c0_22 = arith.constant 0 : index
    %c0_23 = arith.constant 0 : index
    %33 = vector.load %arg11[%c0_22, %c0_23] : memref<2x8xf32, #tpu.memory_space<vmem>>, vector<2x8xf32>
    tpu.vector_store %arg11[%c0_22, %c0_23], %32 {strides = array<i32>} : memref<2x8xf32, #tpu.memory_space<vmem>>, vector<2x8xf32>,
    %cst_24 = arith.constant 0.000000e+00 : f32
    %34 = vector.broadcast %cst_24 : f32 to vector<8x1xf32>
    %35 = arith.maximumf %26, %34 : vector<8x1xf32>
    %36 = math.absf %26 : vector<8x1xf32>
    %cst_25 = arith.constant 0.000000e+00 : f32
    %37 = vector.broadcast %cst_25 : f32 to vector<8x1xf32>
    %38 = arith.subf %37, %36 : vector<8x1xf32>
    %39 = math.exp %38 : vector<8x1xf32>
    %40 = math.log1p %39 : vector<8x1xf32>
    %41 = arith.addf %35, %40 : vector<8x1xf32>
    %c8_i32_26 = arith.constant 8 : i32
    %42 = vector.broadcast %c8_i32_26 : i32 to vector<8x1xi32>
    %43 = arith.cmpi slt, %3, %42 : vector<8x1xi32>
    %cst_27 = arith.constant 0.000000e+00 : f32
    %44 = vector.broadcast %cst_27 : f32 to vector<8x1xf32>
    %45 = arith.select %43, %41, %44 : vector<8x1xi1>, vector<8x1xf32>
    %46 = vector.shape_cast %45 : vector<8x1xf32> to vector<1x8x1xf32>
    %cst_28 = arith.constant dense<0.000000e+00> : vector<1xf32>
    %47 = vector.multi_reduction <add>, %46, %cst_28 [1, 2] : vector<1x8x1xf32> to vector<1xf32>
    %48 = vector.shape_cast %47 : vector<1xf32> to vector<1x1x1xf32>
    %49 = vector.extract %48[0, 0, 0] : f32 from vector<1x1x1xf32>
    %c0_29 = arith.constant 0 : index
    %c0_30 = arith.constant 0 : index
    %50 = vector.load %arg2[%c0_29, %c0_30] : memref<8x32xf32, #tpu.memory_space<vmem>>, vector<8x32xf32>
    %c0_31 = arith.constant 0 : index
    %c0_32 = arith.constant 0 : index
    %51 = vector.load %arg3[%c0_31, %c0_32] : memref<32x32xf32, #tpu.memory_space<vmem>>, vector<32x32xf32>
    %cst_33 = arith.constant dense<0.000000e+00> : vector<8x32xf32>
    %52 = tpu.matmul %50, %51, %cst_33 {dimension_numbers = #tpu.dot_dimension_numbers<[1], [0], [0], [1], [0, 0, 1, 1], [], []>} : vector<8x32xf32>, vector<32x32xf32>, vector<8x32xf32> -> vector<8x32xf32>
    %c0_34 = arith.constant 0 : index
    %c0_35 = arith.constant 0 : index
    %53 = vector.load %arg4[%c0_34, %c0_35] : memref<1x32xf32, #tpu.memory_space<vmem>>, vector<1x32xf32>
    %54 = vector.broadcast %53 : vector<1x32xf32> to vector<8x32xf32>
    %55 = arith.addf %52, %54 : vector<8x32xf32>
    %cst_36 = arith.constant 0.000000e+00 : f32
    %56 = vector.broadcast %cst_36 : f32 to vector<8x32xf32>
    %57 = arith.maximumf %55, %56 : vector<8x32xf32>
    %c0_37 = arith.constant 0 : index
    %c0_38 = arith.constant 0 : index
    %58 = vector.load %arg5[%c0_37, %c0_38] : memref<32x16xf32, #tpu.memory_space<vmem>>, vector<32x16xf32>
    %cst_39 = arith.constant dense<0.000000e+00> : vector<8x16xf32>
    %59 = tpu.matmul %57, %58, %cst_39 {dimension_numbers = #tpu.dot_dimension_numbers<[1], [0], [0], [1], [0, 0, 1, 1], [], []>} : vector<8x32xf32>, vector<32x16xf32>, vector<8x16xf32> -> vector<8x16xf32>
    %c0_40 = arith.constant 0 : index
    %c0_41 = arith.constant 0 : index
    %60 = vector.load %arg6[%c0_40, %c0_41] : memref<1x16xf32, #tpu.memory_space<vmem>>, vector<1x16xf32>
    %61 = vector.broadcast %60 : vector<1x16xf32> to vector<8x16xf32>
    %62 = arith.addf %59, %61 : vector<8x16xf32>
    %cst_42 = arith.constant 0.000000e+00 : f32
    %63 = vector.broadcast %cst_42 : f32 to vector<8x16xf32>
    %64 = arith.maximumf %62, %63 : vector<8x16xf32>
    %c0_43 = arith.constant 0 : index
    %c0_44 = arith.constant 0 : index
    %65 = vector.load %arg7[%c0_43, %c0_44] : memref<1x16xf32, #tpu.memory_space<vmem>>, vector<1x16xf32>
    %66 = vector.broadcast %65 : vector<1x16xf32> to vector<8x16xf32>
    %67 = arith.mulf %64, %66 : vector<8x16xf32>
    %cst_45 = arith.constant dense<0.000000e+00> : vector<8xf32>
    %68 = vector.multi_reduction <add>, %67, %cst_45 [1] : vector<8x16xf32> to vector<8xf32>
    %69 = vector.shape_cast %68 : vector<8xf32> to vector<8x1xf32>
    %c0_46 = arith.constant 0 : index
    %c0_47 = arith.constant 0 : index
    %70 = vector.load %arg8[%c0_46, %c0_47] : memref<1x1xf32, #tpu.memory_space<vmem>>, vector<1x1xf32>
    %71 = vector.broadcast %70 : vector<1x1xf32> to vector<8x1xf32>
    %72 = arith.addf %69, %71 : vector<8x1xf32>
    %c0_48 = arith.constant 0 : index
    %c0_49 = arith.constant 0 : index
    %73 = vector.load %arg9[%c0_48, %c0_49] : memref<8x32xf32, #tpu.memory_space<vmem>>, vector<8x32xf32>
    %cst_50 = arith.constant dense<0.000000e+00> : vector<8x8xf32>
    %74 = tpu.matmul %73, %57, %cst_50 {dimension_numbers = #tpu.dot_dimension_numbers<[1], [1], [0], [0], [0, 0, 1, 0], [], []>} : vector<8x32xf32>, vector<8x32xf32>, vector<8x8xf32> -> vector<8x8xf32>
    %c0_51 = arith.constant 0 : index
    %c0_52 = arith.constant 0 : index
    %75 = vector.load %arg10[%c0_51, %c0_52] : memref<8x1xf32, #tpu.memory_space<vmem>>, vector<8x1xf32>
    %76 = vector.broadcast %75 : vector<8x1xf32> to vector<8x8xf32>
    %77 = arith.addf %74, %76 : vector<8x8xf32>
    %78 = vector.extract_strided_slice %77 {offsets = [0, 0], sizes = [2, 8], strides = [1, 1]} : vector<8x8xf32> to vector<2x8xf32>
    %c0_53 = arith.constant 0 : index
    %c0_54 = arith.constant 0 : index
    %79 = vector.load %arg12[%c0_53, %c0_54] : memref<2x8xf32, #tpu.memory_space<vmem>>, vector<2x8xf32>
    tpu.vector_store %arg12[%c0_53, %c0_54], %78 {strides = array<i32>} : memref<2x8xf32, #tpu.memory_space<vmem>>, vector<2x8xf32>,
    %cst_55 = arith.constant 0.000000e+00 : f32
    %80 = vector.broadcast %cst_55 : f32 to vector<8x1xf32>
    %81 = arith.maximumf %72, %80 : vector<8x1xf32>
    %82 = math.absf %72 : vector<8x1xf32>
    %cst_56 = arith.constant 0.000000e+00 : f32
    %83 = vector.broadcast %cst_56 : f32 to vector<8x1xf32>
    %84 = arith.subf %83, %82 : vector<8x1xf32>
    %85 = math.exp %84 : vector<8x1xf32>
    %86 = math.log1p %85 : vector<8x1xf32>
    %87 = arith.addf %81, %86 : vector<8x1xf32>
    %88 = arith.subf %87, %72 : vector<8x1xf32>
    %c8_i32_57 = arith.constant 8 : i32
    %89 = vector.broadcast %c8_i32_57 : i32 to vector<8x1xi32>
    %90 = arith.cmpi slt, %3, %89 : vector<8x1xi32>
    %cst_58 = arith.constant 0.000000e+00 : f32
    %91 = vector.broadcast %cst_58 : f32 to vector<8x1xf32>
    %92 = arith.select %90, %88, %91 : vector<8x1xi1>, vector<8x1xf32>
    %93 = vector.shape_cast %92 : vector<8x1xf32> to vector<1x8x1xf32>
    %cst_59 = arith.constant dense<0.000000e+00> : vector<1xf32>
    %94 = vector.multi_reduction <add>, %93, %cst_59 [1, 2] : vector<1x8x1xf32> to vector<1xf32>
    %95 = vector.shape_cast %94 : vector<1xf32> to vector<1x1x1xf32>
    %96 = vector.extract %95[0, 0, 0] : f32 from vector<1x1x1xf32>
    %97 = tpu.iota {dimensions = array<i32: 0>} : vector<8x128xi32>
    %98 = tpu.iota {dimensions = array<i32: 1>} : vector<8x128xi32>
    %c0_i32 = arith.constant 0 : i32
    %99 = vector.broadcast %c0_i32 : i32 to vector<8x128xi32>
    %100 = arith.cmpi eq, %98, %99 : vector<8x128xi32>
    %c1_i32 = arith.constant 1 : i32
    %101 = vector.broadcast %c1_i32 : i32 to vector<8x128xi32>
    %102 = arith.cmpi eq, %98, %101 : vector<8x128xi32>
    %cst_60 = arith.constant 0.000000e+00 : f32
    %103 = vector.broadcast %96 : f32 to vector<8x128xf32>
    %104 = vector.broadcast %cst_60 : f32 to vector<8x128xf32>
    %105 = arith.select %102, %103, %104 : vector<8x128xi1>, vector<8x128xf32>
    %106 = vector.broadcast %49 : f32 to vector<8x128xf32>
    %107 = arith.select %100, %106, %105 : vector<8x128xi1>, vector<8x128xf32>
    %c0_i32_61 = arith.constant 0 : i32
    %108 = vector.broadcast %c0_i32_61 : i32 to vector<8x128xi32>
    %109 = arith.cmpi eq, %97, %108 : vector<8x128xi32>
    %cst_62 = arith.constant 0.000000e+00 : f32
    %110 = vector.broadcast %cst_62 : f32 to vector<8x128xf32>
    %111 = arith.select %109, %107, %110 : vector<8x128xi1>, vector<8x128xf32>
    %c0_63 = arith.constant 0 : index
    %c0_64 = arith.constant 0 : index
    %c0_65 = arith.constant 0 : index
    %112 = vector.load %arg13[%c0_63, %c0_64, %c0_65] : memref<1x8x128xf32, #tpu.memory_space<vmem>>, vector<1x8x128xf32>
    %113 = vector.shape_cast %112 : vector<1x8x128xf32> to vector<8x128xf32>
    %114 = vector.shape_cast %111 : vector<8x128xf32> to vector<1x8x128xf32>
    tpu.vector_store %arg13[%c0_63, %c0_64, %c0_65], %114 {strides = array<i32>} : memref<1x8x128xf32, #tpu.memory_space<vmem>>, vector<1x8x128xf32>,
    return
  }
  func.func @transform_0(%arg0: i32) -> (i32, i32) {
    %c0_i32 = arith.constant 0 : i32
    %0 = arith.minsi %arg0, %c0_i32 : i32
    %c0_i32_0 = arith.constant 0 : i32
    %c0_i32_1 = arith.constant 0 : i32
    return %0, %c0_i32_0 : i32, i32
  }
  func.func @transform_1(%arg0: i32) -> (i32, i32) {
    %c0_i32 = arith.constant 0 : i32
    %0 = arith.minsi %arg0, %c0_i32 : i32
    %c0_i32_0 = arith.constant 0 : i32
    %c0_i32_1 = arith.constant 0 : i32
    return %0, %c0_i32_0 : i32, i32
  }
  func.func @transform_2(%arg0: i32) -> (i32, i32) {
    %c0_i32 = arith.constant 0 : i32
    %c0_i32_0 = arith.constant 0 : i32
    %c0_i32_1 = arith.constant 0 : i32
    return %c0_i32, %c0_i32_0 : i32, i32
  }
  func.func @transform_3(%arg0: i32) -> (i32, i32) {
    %c0_i32 = arith.constant 0 : i32
    %c0_i32_0 = arith.constant 0 : i32
    %c0_i32_1 = arith.constant 0 : i32
    return %c0_i32, %c0_i32_0 : i32, i32
  }
  func.func @transform_4(%arg0: i32) -> (i32, i32) {
    %c0_i32 = arith.constant 0 : i32
    %c0_i32_0 = arith.constant 0 : i32
    %c0_i32_1 = arith.constant 0 : i32
    return %c0_i32, %c0_i32_0 : i32, i32
  }
  func.func @transform_5(%arg0: i32) -> (i32, i32) {
    %c0_i32 = arith.constant 0 : i32
    %c0_i32_0 = arith.constant 0 : i32
    %c0_i32_1 = arith.constant 0 : i32
    return %c0_i32, %c0_i32_0 : i32, i32
  }
  func.func @transform_6(%arg0: i32) -> (i32, i32) {
    %c0_i32 = arith.constant 0 : i32
    %c0_i32_0 = arith.constant 0 : i32
    %c0_i32_1 = arith.constant 0 : i32
    return %c0_i32, %c0_i32_0 : i32, i32
  }
  func.func @transform_7(%arg0: i32) -> (i32, i32) {
    %c0_i32 = arith.constant 0 : i32
    %c0_i32_0 = arith.constant 0 : i32
    %c0_i32_1 = arith.constant 0 : i32
    return %c0_i32, %c0_i32_0 : i32, i32
  }
  func.func @transform_8(%arg0: i32) -> (i32, i32) {
    %c0_i32 = arith.constant 0 : i32
    %c0_i32_0 = arith.constant 0 : i32
    %c0_i32_1 = arith.constant 0 : i32
    return %c0_i32, %c0_i32_0 : i32, i32
  }
  func.func @transform_9(%arg0: i32) -> (i32, i32) {
    %c0_i32 = arith.constant 0 : i32
    %c0_i32_0 = arith.constant 0 : i32
    %c0_i32_1 = arith.constant 0 : i32
    return %c0_i32, %c0_i32_0 : i32, i32
  }
  func.func @transform_10(%arg0: i32) -> (i32, i32) {
    %c0_i32 = arith.constant 0 : i32
    %c0_i32_0 = arith.constant 0 : i32
    return %c0_i32, %arg0 : i32, i32
  }
  func.func @transform_11(%arg0: i32) -> (i32, i32) {
    %c0_i32 = arith.constant 0 : i32
    %c0_i32_0 = arith.constant 0 : i32
    return %c0_i32, %arg0 : i32, i32
  }
  func.func @transform_12(%arg0: i32) -> (i32, i32, i32) {
    %c0_i32 = arith.constant 0 : i32
    %c0_i32_0 = arith.constant 0 : i32
    %c0_i32_1 = arith.constant 0 : i32
    return %arg0, %c0_i32, %c0_i32_0 : i32, i32, i32
  }
}

</mosaic_0001>

<bundles_post_ra>
// kernel: darec_forward.1
= control target key start
LH: loop header
LB: loop body
LE: loop exit
PB: predicated region body
PF: predicated region fallthrough
CT: control target
= control target key end

     0   :  { %s1038_s0 = inlined_call_operand.vmem [shape: f32[8,32], index: 0, kind: input, shape index: {}]   ;;  %s1039_s1 = inlined_call_operand.vmem [shape: f32[8,32], index: 1, kind: input, shape index: {}]   ;;  %s1040_s2 = inlined_call_operand.vmem [shape: f32[32,32], index: 2, kind: input, shape index: {}]   ;;  %s1041_s3 = inlined_call_operand.vmem [shape: f32[1,32], index: 3, kind: input, shape index: {}]   ;;  %s1042_s4 = inlined_call_operand.vmem [shape: f32[32,16], index: 4, kind: input, shape index: {}]   ;;  %s1043_s5 = inlined_call_operand.vmem [shape: f32[1,16], index: 5, kind: input, shape index: {}]   ;;  %s1044_s6 = inlined_call_operand.vmem [shape: f32[1,16], index: 6, kind: input, shape index: {}]   ;;  %s1045_s7 = inlined_call_operand.<no memory space> [shape: f32[1,1], index: 7, kind: input, shape index: {}]   ;;  %s1046_s8 = inlined_call_operand.vmem [shape: f32[8,32], index: 8, kind: input, shape index: {}]   ;;  %s1047_s9 = inlined_call_operand.vmem [shape: f32[8,1], index: 9, kind: input, shape index: {}]   ;;  %s1048_s10 = inlined_call_operand.hbm [shape: f32[2,8], index: 10, kind: output, shape index: {0}]   ;;  %s1049_s11 = inlined_call_operand.hbm [shape: f32[2,8], index: 11, kind: output, shape index: {1}]   ;;  %s1050_s12 = inlined_call_operand.vmem [shape: f32[1,8,128], index: 12, kind: output, shape index: {2}]  }
   0x1   :  { %v18_v0 = vstv %s1045_s7 }
   0x2   :  { %19 = vst [vmem:[#allocation2] sm:$0x1] %v18_v0 }
   0x3   :  { %20 = vsyncpa [#allocation4], 0  ;;  %v48_v1 = vld [vmem:[%s1040_s2] sm:$0xff]  ;;  %v49_v2 = vld [vmem:[%s1040_s2 + $0x8] sm:$0xff]  ;;  %v876_v4 = vmov 0.0|0.0   ;;  %vm877_vm0 = vmmov 0  }
   0x4   :  { %v50_v3 = vld [vmem:[%s1040_s2 + $0x10] sm:$0xff]  ;;  %784 = vmatprep.subr.bf16.mxu0 %v876_v4  ;;  %v785_v5 = vpack.c.bf16 %v49_v2, %v48_v1  ;;  %v51_v6 = vld [vmem:[%s1040_s2 + $0x18] sm:$0xff]  ;;  %v878_v7 = vmov 0.0   ;;  %v134_v8 = vld [vmem:[%s1042_s4] sm:$0xff]  ;;  %790 = vmatprep.subr.bf16.mxu1 %v876_v4 }
   0x5   :  { %738 = vmatprep.mubr.msk.f32.mxu0 %vm877_vm0, %v878_v7  ;;  %v135_v9 = vld [vmem:[%s1042_s4 + $0x8] sm:$0xff]  ;;  %749 = vmatprep.mubr.msk.f32.mxu1 %vm877_vm0, %v878_v7 }
   0x6   :  { %21 = vsyncpa [#allocation6], 0  ;;  %786 = vmatpush3.bf16.msra.mxu0 %v785_v5  ;;  %v788_v10 = vpack.c.bf16 %v51_v6, %v50_v3  ;;  %v791_v11 = vpack.c.bf16 %v135_v9, %v134_v8  ;;  %v47_v12 = vld [vmem:[%s1038_s0] sm:$0xff]  ;;  %vm59_vm1 = vcmask 261120   ;;  %v136_v13 = vld [vmem:[%s1042_s4 + $0x10] sm:$0xff]  ;;  %v879_v31 = vmov 0  }
   0x7   :  { %787 = vmatprep.subr.bf16.mxu0 %v876_v4  ;;  %v137_v14 = vld [vmem:[%s1042_s4 + $0x18] sm:$0xff]  ;;  %v690_v16 = vld [vmem:[%s1041_s3] ss:$0 sm:$0xff]  ;;  %818 = vset.pattern.permute.xlu0 %v879_v31  ;;  %vm227_vm2 = vcmask 130048   ;;  %vm319_vm3 = vcmask 58368   ;;  %vm338_vm6 = vcmask 7168  }
   0x8   :  { %792 = vmatpush3.bf16.msra.mxu1 %v791_v11  ;;  %v794_v15 = vpack.c.bf16 %v137_v14, %v136_v13  ;;  %v349_v21 = vld [vmem:[%s1039_s1] sm:$0xff]  ;;  %819 = vset.pattern.permute.xlu1 %v879_v31 }
   0x9   :  { %793 = vmatprep.subr.bf16.mxu1 %v876_v4  ;;  %v239_v22 = vld [vmem:[%s1046_s8] sm:$0xff] }
   0xa   :  { %789 = vmatpush3.bf16.msra.mxu0 %v788_v10  ;;  %v692_v32 = vld [vmem:[%s1043_s5] ss:$0 sm:$0xff]  ;;  %s880_s5 = smov [#allocation3]  }
   0xb   :  { %752 = vmatprep.subr.mxu0 %v878_v7  ;;  %v702_v39 = vld [vmem:[%s1044_s6] ss:$0 sm:$0xff]  ;;  %s664_s6 = sshll.u32 %s880_s5, 4  ;;  %s665_s6 = int_to_ptr.vmem [resolvable:$true] %s664_s6 }
   0xc   :  { %795 = vmatpush3.bf16.msra.mxu1 %v794_v15  ;;  %v240_v44 = vld [vmem:[%s1047_s9] sm:$0xff]  ;;  %s828_s9 = scalar_lea.vmem %s665_s6, 32  ;;  %p833_p1 = scmp.lt.s32.totalorder %s665_s6, %s665_s6 }
   0xd   :  { %739 = vmatmul.mubr.msk.f32.vlgmr.msra.gmra.mrb[0].mxu0 %vm59_vm1, %v47_v12  ;;  %796 = vmatprep.subr.bf16.mxu1 %v876_v4  ;;  %v703_v45 = vld [vmem:[#allocation2] ss:$0 sm:$0xff]  ;;  %p829_p0 = scmp.ne.s32.totalorder %s665_s6, %s828_s9  ;;  %p834_p2 = scmp.lt.s32.totalorder %s828_s9, %s828_s9 }
   0xe   :  { %754 = vmatprep.mubr.msk.f32.mxu0 %vm877_vm0, %v878_v7 }
   0xf   :  { %p835_p3 = por %p834_p2, %p833_p1 }
  0x11   :  { %p836_p4 = pnand %p835_p3, %p829_p0 }
  0xe0   :  { %v129_v17 = vpop.f32.mrb[0].mxu0 }
  0xe1   :  { %v130_v18 = vadd.f32 %v690_v16, %v129_v17  ;;  %v740_v19 = vpop.f32.mrb[1].mxu0 }
  0xe3   :  { %v133_v20 = vmax.f32 %v130_v18, 0.0 }
  0xe5   :  { %750 = vmatmul.mubr.msk.f32.vlgmr.msra.gmra.mrb[0].mxu1 %vm59_vm1, %v133_v20  ;;  %753 = vmatpush3.xpose.msk.msra.mxu0 %vm59_vm1, %v133_v20 }
  0xe6   :  { %798 = vmatpush3.bf16.msra.mxu1 %v785_v5  ;;  %765 = vmatprep.mubr.msk.f32.mxu1 %vm877_vm0, %v878_v7 }
  0xe7   :  { %799 = vmatprep.subr.bf16.mxu1 %v876_v4  ;;  %802 = vmatprep.subr.bf16.mxu0 %v876_v4 }
  0xe8   :  { %755 = vmatmul.mubr.msk.f32.vlgmr.msra.gmra.mrb[2].mxu0 %vm59_vm1, %v239_v22 }
  0xe9   :  { %804 = vmatpush3.bf16.msra.mxu0 %v791_v11  ;;  %776 = vmatprep.mubr.msk.f32.mxu0 %vm877_vm0, %v878_v7 }
  0xea   :  { %801 = vmatpush3.bf16.msra.mxu1 %v788_v10  ;;  %805 = vmatprep.subr.bf16.mxu0 %v876_v4 }
  0xeb   :  { %779 = vmatprep.subr.mxu1 %v878_v7 }
  0xed   :  { %766 = vmatmul.mubr.msk.f32.vlgmr.msra.gmra.mrb[2].mxu1 %vm59_vm1, %v349_v21  ;;  %807 = vmatpush3.bf16.msra.mxu0 %v794_v15 }
  0xee   :  { %781 = vmatprep.mubr.msk.f32.mxu1 %vm877_vm0, %v878_v7 }
 0x1b8   :  { %v214_v23 = vpop.f32.mrb[0].mxu1 }
 0x1b9   :  { %v751_v24 = vpop.f32.mrb[1].mxu1  ;;  %v215_v33 = vadd.f32 %v692_v32, %v214_v23 }
 0x1bb   :  { %v315_v29 = vpop.f32.mrb[2].mxu0  ;;  %v218_v37 = vmax.f32 %v215_v33, 0.0 }
 0x1bc   :  { %v756_v30 = vpop.f32.mrb[3].mxu0 }
 0x1bd   :  { %v226_v42 = vmul.f32 %v702_v39, %v218_v37 }
 0x1bf   :  { %v228_v43 = vsel %vm227_vm2, %v226_v42, 0.0 }
 0x1c0   :  { %v430_v25 = vpop.f32.mrb[2].mxu1 }
 0x1c1   :  { %v431_v26 = vadd.f32 %v690_v16, %v430_v25  ;;  %v767_v27 = vpop.f32.mrb[3].mxu1 }
 0x1c3   :  { %v434_v28 = vmax.f32 %v431_v26, 0.0 }
 0x1c5   :  { %777 = vmatmul.mubr.msk.f32.vlgmr.msra.gmra.mrb[4].mxu0 %vm59_vm1, %v434_v28  ;;  %780 = vmatpush3.xpose.msk.msra.mxu1 %vm59_vm1, %v434_v28 }
 0x1c8   :  { %782 = vmatmul.mubr.msk.f32.vlgmr.msra.gmra.mrb[4].mxu1 %vm59_vm1, %v239_v22 }
 0x298   :  { %v515_v34 = vpop.f32.mrb[4].mxu0 }
 0x299   :  { %v516_v35 = vadd.f32 %v692_v32, %v515_v34  ;;  %v778_v36 = vpop.f32.mrb[5].mxu0 }
 0x29b   :  { %v519_v38 = vmax.f32 %v516_v35, 0.0  ;;  %v615_v19 = vpop.f32.mrb[4].mxu1 }
 0x29c   :  { %v783_v20 = vpop.f32.mrb[5].mxu1 }
 0x29d   :  { %v527_v40 = vmul.f32 %v702_v39, %v519_v38 }
 0x29f   :  { %v528_v41 = vsel %vm227_vm2, %v527_v40, 0.0 }
 0x2a0   :  { %529 = vadd.xlane.f32.xlu0 %v528_v41 }
 0x2a4   :  { %229 = vadd.xlane.f32.xlu0 %v228_v43 }
 0x2ba   :  { %243 = vperm.xlu0 %818, %v240_v44  }
 0x32d   :  { %v530_v46 = vpop.xlane.xlu0 %529 }
 0x32e   :  { %v538_v47 = vadd.f32 %v703_v45, %v530_v46 }
 0x330   :  { %v621_v48 = vand.u32 2147483647, %v538_v47  ;;  %v620_v9 = vmax.f32 %v538_v47, 0.0 }
 0x331   :  { %v230_v49 = vpop.xlane.xlu0 %229 }
 0x332   :  { %v622_v50 = vsub.f32 0.0, %v621_v48  ;;  %v238_v51 = vadd.f32 %v703_v45, %v230_v49 }
 0x334   :  { %v623_v52 = vmul.f32 1.442695, %v622_v50  ;;  %v322_v53 = vand.u32 2147483647, %v238_v51  ;;  %v321_v12 = vmax.f32 %v238_v51, 0.0 }
 0x336   :  { %820 = vpow2.f32 %v623_v52  ;;  %v323_v54 = vsub.f32 0.0, %v322_v53 }
 0x338   :  { %v324_v55 = vmul.f32 1.442695, %v323_v54 }
 0x339   :  { %v244_v56 = vpop.permute.xlu0 %243 }
 0x33a   :  { %822 = vpow2.f32 %v324_v55  ;;  %v316_v57 = vadd.f32 %v315_v29, %v244_v56 }
 0x33c   :  { %320 = vst.msk [vmem:[#allocation3] sm:$0x3] %vm319_vm3, %v316_v57 }
 0x340   :  { %v821_v58 = vpop.eup %820 }
 0x341   :  { %v625_v59 = vadd.f32 1.0, %v821_v58  ;;  %v628_v62 = vmul.f32 -0.5, %v821_v58  ;;  %v631_v1 = vand.u32 2147483647, %v821_v58 }
 0x343   :  { %824 = vlog2.f32 %v625_v59  ;;  %v629_v0 = vadd.f32 1.0, %v628_v62  ;;  %vm632_vm4 = vcmp.lt.f32.partialorder %v631_v1, 0.0004427343 }
 0x344   :  { %v823_v60 = vpop.eup %822 }
 0x345   :  { %v326_v61 = vadd.f32 1.0, %v823_v60  ;;  %v329_v63 = vmul.f32 -0.5, %v823_v60  ;;  %v630_v5 = vmul.f32 %v821_v58, %v629_v0  ;;  %v332_v6 = vand.u32 2147483647, %v823_v60 }
 0x347   :  { %826 = vlog2.f32 %v326_v61  ;;  %v330_v3 = vadd.f32 1.0, %v329_v63  ;;  %vm333_vm5 = vcmp.lt.f32.partialorder %v332_v6, 0.0004427343 }
 0x349   :  { %v331_v11 = vmul.f32 %v823_v60, %v330_v3 }
 0x34d   :  { %v825_v2 = vpop.eup %824 }
 0x34e   :  { %v627_v4 = vmul.f32 0.6931472, %v825_v2 }
 0x350   :  { %v633_v7 = vsel %vm632_vm4, %v630_v5, %v627_v4 }
 0x351   :  { %v827_v8 = vpop.eup %826  ;;  %v634_v13 = vadd.f32 %v633_v7, %v620_v9 }
 0x352   :  { %v328_v10 = vmul.f32 0.6931472, %v827_v8 }
 0x353   :  { %v635_v17 = vsub.f32 %v634_v13, %v538_v47 }
 0x354   :  { %v334_v14 = vsel %vm333_vm5, %v331_v11, %v328_v10 }
 0x355   :  { %v335_v15 = vadd.f32 %v334_v14, %v321_v12  ;;  %v637_v18 = vsel %vm338_vm6, %v635_v17, 0.0 }
 0x357   :  { %v339_v16 = vsel %vm338_vm6, %v335_v15, 0.0 }
 0x358   :  { %340 = vadd.xlane.f32.xlu1 %v339_v16 }
 0x35c   :  { %638 = vadd.xlane.f32.xlu1 %v637_v18 }
 0x36d   :  { %543 = vperm.xlu1 %819, %v240_v44  }
 0x36e   :  { %839 = shalt.err (!%p836_p4)
}
 0x36f   :  { %s840_s30 = scalar_lea.hbm %s1048_s10, 32 }
 0x370   :  { %p841_p5 = scmp.ne.s32.totalorder %s1048_s10, %s840_s30  ;;  %p844_p6 = scmp.lt.u32.totalorder %s840_s30, %s1048_s10 }
 0x372   :  { %p846_p7 = pnand %p844_p6, %p841_p5 }
 0x374   :  { %849 = shalt.err (!%p846_p7)
}
 0x375   :  { %667 = dma.vmem_to_hbm [thread:$0]  %s665_s6, 32, %s1048_s10, [#allocation4]  }
 0x376   :  { %s881_s17 = smov [#allocation5]  }
 0x377   :  { %s674_s18 = sshll.u32 %s881_s17, 4  ;;  %s675_s18 = int_to_ptr.vmem [resolvable:$true] %s674_s18 }
 0x378   :  { %s850_s10 = scalar_lea.vmem %s675_s18, 32  ;;  %p855_p9 = scmp.lt.s32.totalorder %s675_s18, %s675_s18 }
 0x379   :  { %p851_p8 = scmp.ne.s32.totalorder %s675_s18, %s850_s10  ;;  %p856_p10 = scmp.lt.s32.totalorder %s850_s10, %s850_s10 }
 0x37b   :  { %p857_p11 = por %p856_p10, %p855_p9 }
 0x37d   :  { %p858_p12 = pnand %p857_p11, %p851_p8 }
 0x3e5   :  { %v341_v21 = vpop.xlane.xlu1 %340 }
 0x3e6   :  { %v342_v22 = vrot.slane %v341_v21, 4 }
 0x3e8   :  { %v343_v23 = vadd.f32 %v342_v22, %v341_v21 }
 0x3e9   :  { %v639_v24 = vpop.xlane.xlu1 %638 }
 0x3ea   :  { %v344_v25 = vrot.slane %v343_v23, 2  ;;  %v640_v26 = vrot.slane %v639_v24, 4 }
 0x3ec   :  { %v641_v27 = vadd.f32 %v640_v26, %v639_v24  ;;  %v345_v28 = vadd.f32 %v344_v25, %v343_v23 }
 0x3ed   :  { %v544_v29 = vpop.permute.xlu1 %543 }
 0x3ee   :  { %v642_v30 = vrot.slane %v641_v27, 2  ;;  %v346_v31 = vrot.slane %v345_v28, 1  ;;  %v616_v32 = vadd.f32 %v615_v19, %v544_v29 }
 0x3f0   :  { %v347_v33 = vadd.f32 %v346_v31, %v345_v28  ;;  %v643_v34 = vadd.f32 %v642_v30, %v641_v27  ;;  %619 = vst.msk [vmem:[#allocation5] sm:$0x3] %vm319_vm3, %v616_v32 }
 0x3f1   :  { %861 = shalt.err (!%p858_p12)
}
 0x3f2   :  { %s862_s21 = scalar_lea.hbm %s1049_s11, 32 }
 0x3f3   :  { %p863_p13 = scmp.ne.s32.totalorder %s1049_s11, %s862_s21  ;;  %p866_p0 = scmp.lt.u32.totalorder %s862_s21, %s1049_s11 }
 0x3f5   :  { %p868_p1 = pnand %p866_p0, %p863_p13 }
 0x3f7   :  { %871 = shalt.err (!%p868_p1)
}
 0x3f8   :  { %677 = dma.vmem_to_hbm [thread:$0]  %s675_s18, 32, %s1049_s11, [#allocation6]   ;;  %808 = vpush %v347_v33  ;;  %v644_v35 = vrot.slane %v643_v34, 1  ;;  %v43_v37 = vlaneseq }
 0x3fa   :  { %v645_v36 = vadd.f32 %v644_v35, %v643_v34  ;;  %v648_v38 = vand.u32 127, %v43_v37  ;;  %v44_v39 = vshrl.u32 %v43_v37, 7 }
 0x3fc   :  { %810 = vpush %v645_v36  ;;  %vm650_vm7 = vcmp.eq.s32.totalorder %v648_v38, 1  ;;  %vm649_vm8 = vcmp.eq.s32.totalorder %v648_v38, 0  ;;  %vm655_vm9 = vcmp.eq.s32.totalorder %v44_v39, 0 }
 0x429   :  { %s809_s8 = spop %808 }
 0x42a   :  { %v653_v41 = vstv %s809_s8 }
 0x42d   :  { %s811_s24 = spop %810 }
 0x42e   :  { %v651_v40 = vstv %s811_s24 }
 0x42f   :  { %v652_v42 = vsel %vm650_vm7, %v651_v40, 0.0 }
 0x430   :  { %v654_v43 = vsel %vm649_vm8, %v653_v41, %v652_v42 }
 0x431   :  { %v656_v44 = vsel %vm655_vm9, %v654_v43, 0.0 }
 0x432   :  { %657 = vst [vmem:[%s1050_s12] sm:$0xff] %v656_v44 }
 0x433   :  { %872 = dma.done.wait [#allocation4], 32  }
 0x434   :  { %873 = vsyncadd [#allocation4], 4294967264 }
 0x435   :  { %874 = dma.done.wait [#allocation6], 32  }
 0x436   :  { %875 = vsyncadd [#allocation6], 4294967264 }
 0x437   :  { %688 = vsyncpa [#allocation4], 1 }
 0x438   :  { %689 = vsyncpa [#allocation6], 1 }

</bundles_post_ra>
